<compile_context>
chip_gen: v7x
topology: tpu7x:2x2x1
jax: 0.10.0
libtpu: 0.0.40
codegen_flags: <defaults>
</compile_context>

<pallas_src>
import functools

import jax
import jax.numpy as jnp
from jax.experimental import pallas as pl
from jax.experimental.pallas import tpu as pltpu

seq_len = 1  # matches the module-level constant in the reference code

# Tile caps, safe on v5e / v6e / v7x (see header comment).
_TM_CAP = 128    # fills the MXU on v5e (128x128); fine on v6e/v7x too
_TK_CAP = 2048   # 2 * tk * tn * 4B double-buffered weight tile <= 8 MiB
_TN_CAP = 512


def _round_up(x, m):
    return ((x + m - 1) // m) * m


def _k_tiling(v):
    """(tk, V_pad) such that tk divides V_pad and tk is lane/sublane friendly."""
    v128 = _round_up(v, 128)
    if v128 <= _TK_CAP:
        return v128, v128
    return _TK_CAP, _round_up(v, _TK_CAP)


def _n_tiling(e):
    """(tn, E_pad). E is NOT padded to 128 when small: a block's last dim may
    equal the full array extent, so the streamed weight stays [V, E]."""
    if e <= _TN_CAP:
        return e, e
    return _TN_CAP, _round_up(e, _TN_CAP)


# ----------------------------- Pallas kernels ------------------------------ #

def _matmul_bias_kernel(x_ref, w_ref, b_ref, o_ref, acc_ref):
    """Multi-K-step tile: f32 accumulator, bias folded into the k==0 init."""
    k = pl.program_id(2)
    partial = jnp.dot(x_ref[...], w_ref[...], preferred_element_type=jnp.float32)

    @pl.when(k == 0)
    def _():
        acc_ref[...] = partial + b_ref[...]

    @pl.when(k > 0)
    def _():
        acc_ref[...] += partial

    @pl.when(k == pl.num_programs(2) - 1)
    def _():
        o_ref[...] = acc_ref[...].astype(o_ref.dtype)


def _matmul_bias_kernel_single_k(x_ref, w_ref, b_ref, o_ref):
    """Single K step (small V): write the output directly, no scratch pass."""
    o_ref[...] = (jnp.dot(x_ref[...], w_ref[...],
                          preferred_element_type=jnp.float32)
                  + b_ref[...]).astype(o_ref.dtype)


# ------------------------------ Pallas wrapper ------------------------------ #

def voxel_linear(x2d, w_t, b2d, out_dim):
    """y = x2d @ w_t + b2d as a tiled, pipelined Pallas matmul, sliced to out_dim.

    x2d : [M, V]          activations (M = batch * seq)
    w_t : [V_pad, E_pad]  weight, pre-transposed AND pre-padded at init
    b2d : [1, E_pad]      bias, pre-padded at init
    """
    M, V = x2d.shape
    V_pad, E_pad = w_t.shape

    tk = V_pad if V_pad <= _TK_CAP else _TK_CAP
    tn = E_pad if E_pad <= _TN_CAP else _TN_CAP
    tm = min(_TM_CAP, _round_up(M, 8))
    M_pad = _round_up(M, tm)

    # Only the (tiny) activation slab is padded on the forward path; the
    # weight/bias padding was hoisted to __init__ so it costs nothing here.
    if (M_pad, V_pad) != (M, V):
        x2d = jnp.pad(x2d, ((0, M_pad - M), (0, V_pad - V)))

    grid = (M_pad // tm, E_pad // tn, V_pad // tk)
    single_k = grid[2] == 1

    kernel = _matmul_bias_kernel_single_k if single_k else _matmul_bias_kernel
    scratch = [] if single_k else [pltpu.VMEM((tm, tn), jnp.float32)]

    itemsize = jnp.dtype(x2d.dtype).itemsize
    cost = pl.CostEstimate(
        flops=2 * M_pad * V_pad * E_pad,
        transcendentals=0,
        bytes_accessed=itemsize * (M_pad * V_pad + V_pad * E_pad
                                   + E_pad + M_pad * E_pad),
    )

    out = pl.pallas_call(
        kernel,
        out_shape=jax.ShapeDtypeStruct((M_pad, E_pad), x2d.dtype),
        grid_spec=pltpu.PrefetchScalarGridSpec(
            num_scalar_prefetch=0,
            grid=grid,
            in_specs=[
                pl.BlockSpec((tm, tk), lambda i, j, k: (i, k)),   # x tile
                pl.BlockSpec((tk, tn), lambda i, j, k: (k, j)),   # W.T tile
                pl.BlockSpec((1, tn), lambda i, j, k: (0, j)),    # bias tile
            ],
            out_specs=pl.BlockSpec((tm, tn), lambda i, j, k: (i, j)),
            scratch_shapes=scratch,
        ),
        compiler_params=pltpu.CompilerParams(
            # M/N parallel, K (reduction) arbitrary. For the demo shapes the
            # grid is (1, 1, K) so this runs on a single TensorCore.
            # TODO(synk): split K into per-core partial sums to use the second
            # v7x TensorCore for tall-K (large-V) subjects.
            dimension_semantics=("parallel", "parallel", "arbitrary"),
        ),
        cost_estimate=cost,
    )(x2d, w_t, b2d)

    return out[:M, :out_dim]


@functools.partial(jax.jit, static_argnames=("out_dim",))
def _encoder_forward(x, w_t, b2d, out_dim):
    # All seq slices share one Linear, so fold seq into the matmul M dimension
    # (single pallas_call instead of per-seq calls + concat).
    B, S, V = x.shape
    y = voxel_linear(x.reshape(B * S, V), w_t, b2d, out_dim)
    return y.reshape(B, S, out_dim)


# --------------------------- Module equivalent ----------------------------- #

class VoxelEncoder:
    """JAX/Pallas equivalent of the PyTorch VoxelEncoder."""

    def __init__(self, voxel_sizes, shared_embed_size, hidden_size, seq_len, key,
                 param_dtype=jnp.float32):
        del hidden_size  # unused in the reference forward pass
        self.shared_embed_size = shared_embed_size
        self.seq_len = seq_len
        self.param_dtype = param_dtype
        self.voxel_sizes = list(voxel_sizes)
        self.params = []
        _, e_pad = _n_tiling(shared_embed_size)
        for vs in voxel_sizes:
            key, kw, kb = jax.random.split(key, 3)
            # torch.nn.Linear init: U(-1/sqrt(V), 1/sqrt(V)); stored
            # pre-transposed [V, E] and pre-padded to tile multiples so the
            # forward path never touches the weight outside the kernel DMA.
            bound = 1.0 / float(vs) ** 0.5
            w_t = jax.random.uniform(kw, (vs, shared_embed_size), jnp.float32,
                                     -bound, bound)
            b2d = jax.random.uniform(kb, (1, shared_embed_size), jnp.float32,
                                     -bound, bound)
            _, v_pad = _k_tiling(vs)
            w_t = jnp.pad(w_t, ((0, v_pad - vs),
                                (0, e_pad - shared_embed_size)))
            b2d = jnp.pad(b2d, ((0, 0), (0, e_pad - shared_embed_size)))
            self.params.append((w_t.astype(param_dtype), b2d.astype(param_dtype)))

    def __call__(self, x, subj_idx):
        w_t, b2d = self.params[subj_idx]
        x = x.astype(self.param_dtype)
        return _encoder_forward(x, w_t, b2d, self.shared_embed_size)


# ------------------------------- Reference --------------------------------- #

def reference_forward(enc, x, subj_idx):
    w_t, b2d = enc.params[subj_idx]
    V = enc.voxel_sizes[subj_idx]
    E = enc.shared_embed_size
    return jnp.einsum("bsv,ve->bse", x, w_t[:V, :E]) + b2d[0, :E]


# --------------------------------- Main ------------------------------------ #

if __name__ == "__main__":
    key = jax.random.PRNGKey(0)
    k_param, k_x = jax.random.split(key)

    # Subjects 0/1 exercise the single-K-tile kernel; subject 2 (V > 2048)
    # exercises the multi-K accumulator kernel.
    voxel_sizes = [32, 48, 2560]
    shared_embed_size = 16
    hidden_size = 32              # unused, kept for signature parity
    batch = 2

    enc = VoxelEncoder(voxel_sizes, shared_embed_size, hidden_size, seq_len,
                       key=k_param)

    subj_idx = 1
    x = jax.random.normal(k_x, (batch, seq_len, voxel_sizes[subj_idx]),
                          dtype=jnp.float32)
    out = jax.block_until_ready(enc(x, subj_idx))
    ref = reference_forward(enc, x, subj_idx)
    assert out.shape == (batch, seq_len, shared_embed_size), out.shape
    assert jnp.allclose(out, ref, atol=1e-5, rtol=1e-5), "mismatch vs reference"

    # Other subjects: different voxel counts / kernel paths.
    x0 = jax.random.normal(jax.random.PRNGKey(1),
                           (batch, seq_len, voxel_sizes[0]), dtype=jnp.float32)
    out0 = jax.block_until_ready(enc(x0, 0))
    ref0 = reference_forward(enc, x0, 0)
    assert jnp.allclose(out0, ref0, atol=1e-5, rtol=1e-5), "mismatch (subj 0)"

    x2 = jax.random.normal(jax.random.PRNGKey(2),
                           (batch, seq_len, voxel_sizes[2]), dtype=jnp.float32)
    out2 = jax.block_until_ready(enc(x2, 2))
    ref2 = reference_forward(enc, x2, 2)
    assert jnp.allclose(out2, ref2, atol=1e-4, rtol=1e-5), "mismatch (subj 2)"

    print("KERNEL_OK")
</pallas_src>

<mosaic_0001>
module attributes {stable_mosaic.version = 11 : i64} {
  func.func @_matmul_bias_kernel_single_k(%arg0: i32, %arg1: i32, %arg2: i32, %arg3: memref<8x128xf32, #tpu.memory_space<vmem>>, %arg4: memref<128x16xf32, #tpu.memory_space<vmem>>, %arg5: memref<1x16xf32, #tpu.memory_space<vmem>>, %arg6: memref<8x16xf32, #tpu.memory_space<vmem>>) attributes {dimension_semantics = [#tpu.dimension_semantics<parallel>, #tpu.dimension_semantics<parallel>, #tpu.dimension_semantics<arbitrary>], iteration_bounds = array<i64: 1, 1, 1>, scalar_prefetch = 0 : i64, scratch_operands = 0 : i64, tpu.core_type = #tpu.core_type<tc>, window_params = [{transform_indices = @transform_0, window_bounds = array<i64: 8, 128>}, {transform_indices = @transform_1, window_bounds = array<i64: 128, 16>}, {transform_indices = @transform_2, window_bounds = array<i64: 1, 16>}, {transform_indices = @transform_3, window_bounds = array<i64: 8, 16>}]} {
    %c0 = arith.constant 0 : index
    %c0_0 = arith.constant 0 : index
    %0 = vector.load %arg3[%c0, %c0_0] : memref<8x128xf32, #tpu.memory_space<vmem>>, vector<8x128xf32>
    %c0_1 = arith.constant 0 : index
    %c0_2 = arith.constant 0 : index
    %1 = vector.load %arg4[%c0_1, %c0_2] : memref<128x16xf32, #tpu.memory_space<vmem>>, vector<128x16xf32>
    %cst = arith.constant dense<0.000000e+00> : vector<8x16xf32>
    %2 = tpu.matmul %0, %1, %cst {dimension_numbers = #tpu.dot_dimension_numbers<[1], [0], [0], [1], [0, 0, 1, 1], [], []>} : vector<8x128xf32>, vector<128x16xf32>, vector<8x16xf32> -> vector<8x16xf32>
    %c0_3 = arith.constant 0 : index
    %c0_4 = arith.constant 0 : index
    %3 = vector.load %arg5[%c0_3, %c0_4] : memref<1x16xf32, #tpu.memory_space<vmem>>, vector<1x16xf32>
    %4 = vector.broadcast %3 : vector<1x16xf32> to vector<8x16xf32>
    %5 = arith.addf %2, %4 : vector<8x16xf32>
    %c0_5 = arith.constant 0 : index
    %c0_6 = arith.constant 0 : index
    %6 = vector.load %arg6[%c0_5, %c0_6] : memref<8x16xf32, #tpu.memory_space<vmem>>, vector<8x16xf32>
    tpu.vector_store %arg6[%c0_5, %c0_6], %5 {strides = array<i32>} : memref<8x16xf32, #tpu.memory_space<vmem>>, vector<8x16xf32>,
    return
  }
  func.func @transform_0(%arg0: i32, %arg1: i32, %arg2: i32) -> (i32, i32) {
    %c0_i32 = arith.constant 0 : i32
    return %arg0, %arg2 : i32, i32
  }
  func.func @transform_1(%arg0: i32, %arg1: i32, %arg2: i32) -> (i32, i32) {
    %c0_i32 = arith.constant 0 : i32
    return %arg2, %arg1 : i32, i32
  }
  func.func @transform_2(%arg0: i32, %arg1: i32, %arg2: i32) -> (i32, i32) {
    %c0_i32 = arith.constant 0 : i32
    %c0_i32_0 = arith.constant 0 : i32
    return %c0_i32, %arg1 : i32, i32
  }
  func.func @transform_3(%arg0: i32, %arg1: i32, %arg2: i32) -> (i32, i32) {
    %c0_i32 = arith.constant 0 : i32
    return %arg0, %arg1 : i32, i32
  }
}

</mosaic_0001>

<bundles_post_ra>
// kernel: _encoder_forward.1
= control target key start
LH: loop header
LB: loop body
LE: loop exit
PB: predicated region body
PF: predicated region fallthrough
CT: control target
= control target key end

     0   :  { %v194_v0 = vmov 0.0|0.0   ;;  %vm195_vm0 = vmmov 0   ;;  %v196_v4 = vmov 0.0   ;;  %vm108_vm1 = vcmask 130048   ;;  %s274_s1 = inlined_call_operand.vmem [shape: f32[128,16], index: 1, kind: input, shape index: {}]   ;;  %s275_s0 = inlined_call_operand.vmem [shape: f32[8,128], index: 0, kind: input, shape index: {}]   ;;  %s276_s2 = inlined_call_operand.vmem [shape: f32[1,16], index: 2, kind: input, shape index: {}]   ;;  %s277_s3 = inlined_call_operand.vmem [shape: f32[8,16], index: 3, kind: output, shape index: {}]  }
   0x1   :  { %167 = vmatprep.subr.bf16.mxu0 %v194_v0  ;;  %v15_v1 = vld [vmem:[%s274_s1] sm:$0xff]  ;;  %v16_v2 = vld [vmem:[%s274_s1 + $0x8] sm:$0xff]  ;;  %v17_v3 = vld [vmem:[%s274_s1 + $0x10] sm:$0xff]  ;;  %164 = vmatprep.mubr.msk.f32.mxu0 %vm195_vm0, %v196_v4 }
   0x2   :  { %v168_v5 = vpack.c.bf16 %v16_v2, %v15_v1  ;;  %v18_v6 = vld [vmem:[%s274_s1 + $0x18] sm:$0xff]  ;;  %v19_v8 = vld [vmem:[%s274_s1 + $0x20] sm:$0xff]  ;;  %v20_v9 = vld [vmem:[%s274_s1 + $0x28] sm:$0xff] }
   0x3   :  { %v171_v7 = vpack.c.bf16 %v18_v6, %v17_v3  ;;  %v174_v10 = vpack.c.bf16 %v20_v9, %v19_v8  ;;  %v21_v11 = vld [vmem:[%s274_s1 + $0x30] sm:$0xff]  ;;  %v22_v12 = vld [vmem:[%s274_s1 + $0x38] sm:$0xff]  ;;  %v23_v14 = vld [vmem:[%s274_s1 + $0x40] sm:$0xff] }
   0x4   :  { %169 = vmatpush3.bf16.msra.mxu0 %v168_v5  ;;  %v177_v13 = vpack.c.bf16 %v22_v12, %v21_v11  ;;  %v24_v15 = vld [vmem:[%s274_s1 + $0x48] sm:$0xff]  ;;  %v25_v17 = vld [vmem:[%s274_s1 + $0x50] sm:$0xff]  ;;  %v26_v18 = vld [vmem:[%s274_s1 + $0x58] sm:$0xff] }
   0x5   :  { %170 = vmatprep.subr.bf16.mxu0 %v194_v0  ;;  %v180_v16 = vpack.c.bf16 %v24_v15, %v23_v14  ;;  %v183_v19 = vpack.c.bf16 %v26_v18, %v25_v17  ;;  %v27_v20 = vld [vmem:[%s274_s1 + $0x60] sm:$0xff]  ;;  %v28_v21 = vld [vmem:[%s274_s1 + $0x68] sm:$0xff]  ;;  %v29_v23 = vld [vmem:[%s274_s1 + $0x70] sm:$0xff] }
   0x6   :  { %v186_v22 = vpack.c.bf16 %v28_v21, %v27_v20  ;;  %v30_v24 = vld [vmem:[%s274_s1 + $0x78] sm:$0xff]  ;;  %v14_v26 = vld [vmem:[%s275_s0] sm:$0xff] }
   0x7   :  { %v189_v25 = vpack.c.bf16 %v30_v24, %v29_v23  ;;  %v114_v27 = vld [vmem:[%s276_s2] ss:$0 sm:$0xff] }
   0x8   :  { %172 = vmatpush3.bf16.msra.mxu0 %v171_v7 }
   0x9   :  { %173 = vmatprep.subr.bf16.mxu0 %v194_v0 }
   0xc   :  { %175 = vmatpush3.bf16.msra.mxu0 %v174_v10 }
   0xd   :  { %176 = vmatprep.subr.bf16.mxu0 %v194_v0 }
  0x10   :  { %178 = vmatpush3.bf16.msra.mxu0 %v177_v13 }
  0x11   :  { %179 = vmatprep.subr.bf16.mxu0 %v194_v0 }
  0x14   :  { %181 = vmatpush3.bf16.msra.mxu0 %v180_v16 }
  0x15   :  { %182 = vmatprep.subr.bf16.mxu0 %v194_v0 }
  0x18   :  { %184 = vmatpush3.bf16.msra.mxu0 %v183_v19 }
  0x19   :  { %185 = vmatprep.subr.bf16.mxu0 %v194_v0 }
  0x1c   :  { %187 = vmatpush3.bf16.msra.mxu0 %v186_v22 }
  0x1d   :  { %188 = vmatprep.subr.bf16.mxu0 %v194_v0 }
  0x20   :  { %190 = vmatpush3.bf16.msra.mxu0 %v189_v25 }
  0x23   :  { %165 = vmatmul.mubr.f32.vlgmr.msra.gmra.mrb[0].mxu0 %v14_v26 }
  0xf6   :  { %v104_v28 = vpop.f32.mrb[0].mxu0 }
  0xf7   :  { %v105_v29 = vadd.f32 %v114_v27, %v104_v28  ;;  %v166_v30 = vpop.f32.mrb[1].mxu0 }
  0xf9   :  { %109 = vst.msk [vmem:[%s277_s3] sm:$0xff] %vm108_vm1, %v105_v29 }

</bundles_post_ra>
